<compile_context>
chip_gen: v7x
topology: tpu7x:2x2x1
jax: 0.10.0
libtpu: 0.0.40
codegen_flags: <defaults>
</compile_context>

<pallas_src>
import jax
import jax.numpy as jnp
from jax import lax
from jax.experimental import pallas as pl
from jax.experimental.pallas import tpu as pltpu


# ----------------------------------------------------------------------------
# Fused decode kernel. Grid = (B, R):
#   axis 0 (parallel)  : one batch element per step (S slot-rows of work),
#   axis 1 (arbitrary) : decode time-step, hidden carried in VMEM scratch.
# GRU cell -> attention over (T,H) encoder outputs -> gate (step 0 only)
# -> vocab softmax -> pointer/vocab switch -> pointer scatter (one-hot matmul)
# -> final mixed distribution.
# ----------------------------------------------------------------------------
def decode_step_kernel(
    x_ref, h0_ref, enc_ref, mask_ref, story_ref,
    embt_ref, wi_ref, wh_ref, bi_ref, bh_ref,
    wg_ref, bg_ref, wrd_ref, wrc_ref, wrx_ref, brat_ref,
    p_out_ref, gate_out_ref, h_out_ref,
    h_scr,
):
    f32, bf16 = jnp.float32, jnp.bfloat16
    r_step = pl.program_id(1)
    H = h_scr.shape[-1]
    V = embt_ref.shape[-1]

    # initialize the carried hidden state at the first decode step of this batch
    @pl.when(r_step == 0)
    def _init():
        h_scr[...] = h0_ref[0]

    x = x_ref[0, 0]                      # (S, H) f32   decoder input for this step
    h = h_scr[...]                       # (S, H) f32   previous hidden

    # --- GRU cell: two fused (S,H)x(H,3H) MXU matmuls (gate order r, z, n) ---
    gi = jnp.dot(x.astype(bf16), wi_ref[...], preferred_element_type=f32) + bi_ref[...]
    gh = jnp.dot(h.astype(bf16), wh_ref[...], preferred_element_type=f32) + bh_ref[...]
    r_g = jax.nn.sigmoid(gi[:, 0:H] + gh[:, 0:H])
    z_g = jax.nn.sigmoid(gi[:, H:2 * H] + gh[:, H:2 * H])
    n_g = jnp.tanh(gi[:, 2 * H:3 * H] + r_g * gh[:, 2 * H:3 * H])
    h_new = (1.0 - z_g) * n_g + z_g * h                      # (S, H) f32

    # --- attention over encoder outputs (MXU, untiled (T,H) encoder) ---
    enc = enc_ref[0]                                          # (T, H) bf16
    scores = lax.dot_general(h_new.astype(bf16), enc,
                             (((1,), (1,)), ((), ())),
                             preferred_element_type=f32)      # (S, T)
    scores = scores + mask_ref[0]                             # (1,T) additive -inf mask
    m = jnp.max(scores, axis=1, keepdims=True)
    e = jnp.exp(scores - m)
    prob = e * pl.reciprocal(jnp.sum(e, axis=1, keepdims=True), approx=True)   # (S,T)
    context = jnp.dot(prob.astype(bf16), enc, preferred_element_type=f32)      # (S,H)

    # --- gate logits: only step 0 is used downstream -> compute/store only there ---
    @pl.when(r_step == 0)
    def _gate():
        gate_out_ref[0] = (jnp.dot(context.astype(bf16), wg_ref[...],
                                   preferred_element_type=f32) + bg_ref[...])

    # --- vocab distribution: softmax(h_new @ emb^T) ---
    logits_v = jnp.dot(h_new.astype(bf16), embt_ref[...],
                       preferred_element_type=f32)            # (S, V)
    mv = jnp.max(logits_v, axis=1, keepdims=True)
    ev = jnp.exp(logits_v - mv)
    p_vocab = ev * pl.reciprocal(jnp.sum(ev, axis=1, keepdims=True), approx=True)

    # --- pointer/vocab switch: sigmoid(W_ratio([dec_state; context; x])) ---
    switch_logit = (jnp.sum(h_new * wrd_ref[...], axis=1, keepdims=True)
                    + jnp.sum(context * wrc_ref[...], axis=1, keepdims=True)
                    + jnp.sum(x * wrx_ref[...], axis=1, keepdims=True)
                    + brat_ref[...])
    switch = jax.nn.sigmoid(switch_logit)                     # (S, 1)

    # --- pointer distribution: scatter_add(prob at story token ids) expressed as a
    #     (S,T)x(T,V) one-hot matmul on the MXU (duplicate tokens accumulate) ---
    tok = story_ref[0]                                        # (1, T) int32
    onehot = (tok[:, :, None]
              == lax.broadcasted_iota(jnp.int32, (1, 1, V), 2)).astype(f32)[0]  # (T,V)
    p_ctx = jnp.dot(prob, onehot, preferred_element_type=f32)                   # (S,V)

    p_out_ref[0, 0] = (1.0 - switch) * p_ctx + switch * p_vocab
    h_scr[...] = h_new

    @pl.when(r_step == pl.num_programs(1) - 1)
    def _final():
        h_out_ref[0] = h_new


def make_decode_fn(R, B, S, T, H, V, Gp):
    H3 = 3 * H

    def const_spec(shape):
        nd = len(shape)
        return pl.BlockSpec(shape, lambda b, r, _nd=nd: (0,) * _nd)

    in_specs = [
        pl.BlockSpec((1, 1, S, H), lambda b, r: (r, b, 0, 0)),   # dec_in   (R,B,S,H) f32
        pl.BlockSpec((1, S, H), lambda b, r: (b, 0, 0)),         # h0       (B,S,H)   f32
        pl.BlockSpec((1, T, H), lambda b, r: (b, 0, 0)),         # enc      (B,T,H)   bf16
        pl.BlockSpec((1, 1, T), lambda b, r: (b, 0, 0)),         # mask     (B,1,T)   f32
        pl.BlockSpec((1, 1, T), lambda b, r: (b, 0, 0)),         # story    (B,1,T)   i32
        const_spec((H, V)),                                      # emb_t    bf16 (resident)
        const_spec((H, H3)),                                     # w_i      bf16 (resident)
        const_spec((H, H3)),                                     # w_h      bf16 (resident)
        const_spec((1, H3)),                                     # b_i
        const_spec((1, H3)),                                     # b_h
        const_spec((H, Gp)),                                     # w_gate   bf16 (padded)
        const_spec((1, Gp)),                                     # b_gate
        const_spec((1, H)),                                      # wr_dec
        const_spec((1, H)),                                      # wr_ctx
        const_spec((1, H)),                                      # wr_x
        const_spec((1, 1)),                                      # b_ratio
    ]
    out_specs = (
        pl.BlockSpec((1, 1, S, V), lambda b, r: (r, b, 0, 0)),   # final p_vocab per step
        pl.BlockSpec((1, S, Gp), lambda b, r: (b, 0, 0)),        # gate logits (step 0)
        pl.BlockSpec((1, S, H), lambda b, r: (b, 0, 0)),         # final hidden
    )
    return pl.pallas_call(
        decode_step_kernel,
        out_shape=(
            jax.ShapeDtypeStruct((R, B, S, V), jnp.float32),
            jax.ShapeDtypeStruct((B, S, Gp), jnp.float32),
            jax.ShapeDtypeStruct((B, S, H), jnp.float32),
        ),
        grid_spec=pltpu.PrefetchScalarGridSpec(
            num_scalar_prefetch=0,
            grid=(B, R),
            in_specs=in_specs,
            out_specs=out_specs,
            scratch_shapes=[pltpu.VMEM((S, H), jnp.float32)],    # hidden-state carry
        ),
        compiler_params=pltpu.CompilerParams(
            dimension_semantics=("parallel", "arbitrary"),
            # explicit budget (fits all generations; re-derive for real V on v7x)
            vmem_limit_bytes=48 * 1024 * 1024,
        ),
    )


# ----------------------------------------------------------------------------
# Host-side wrapper: slot-embedding merge, bf16/fused weight prep, teacher
# forcing input precompute, output reshaping back to (S, B, ...) conventions.
# ----------------------------------------------------------------------------
def generator_forward(params, slot_w2i, batch_size, encoded_hidden,
                      encoded_outputs, encoded_lens, story, max_res_len,
                      target_batches, use_teacher_forcing, slot_temp):
    f32, bf16 = jnp.float32, jnp.bfloat16
    S = len(slot_temp)
    B = batch_size
    V, H = params["embedding"].shape
    T = encoded_outputs.shape[1]
    G = params["b_gate"].shape[1]
    Gp = ((G + 127) // 128) * 128
    R = max_res_len

    # --- fused / pre-transposed / bf16 constants (resident in VMEM across steps) ---
    emb = params["embedding"]
    emb_t = emb.T.astype(bf16)                                                    # (H,V)
    w_i = jnp.concatenate([params["w_ir"], params["w_iz"], params["w_in"]], 1).astype(bf16)
    w_h = jnp.concatenate([params["w_hr"], params["w_hz"], params["w_hn"]], 1).astype(bf16)
    b_i = jnp.concatenate([params["b_ir"], params["b_iz"], params["b_in"]], 1).astype(f32)
    b_h = jnp.concatenate([params["b_hr"], params["b_hz"], params["b_hn"]], 1).astype(f32)
    w_gate = jnp.zeros((H, Gp), f32).at[:, :G].set(params["w_gate"]).astype(bf16)
    b_gate = jnp.zeros((1, Gp), f32).at[:, :G].set(params["b_gate"])
    consts = (emb_t, w_i, w_h, b_i, b_h, w_gate, b_gate,
              params["wr_dec"], params["wr_ctx"], params["wr_x"], params["b_ratio"])

    # --- per-call tensors; encoder side stays UNTILED by S: (B, T, ...) ---
    dom_idx = jnp.array([slot_w2i[s.split("-")[0]] for s in slot_temp], jnp.int32)
    slt_idx = jnp.array([slot_w2i[s.split("-")[1]] for s in slot_temp], jnp.int32)
    slot_embed = params["slot_emb"][dom_idx] + params["slot_emb"][slt_idx]        # (S,H) sum
    x0 = jnp.broadcast_to(slot_embed[None], (B, S, H)).astype(f32)   # dropout(eval)=identity
    h0 = jnp.broadcast_to(encoded_hidden[0][:, None, :], (B, S, H)).astype(f32)

    enc = encoded_outputs.astype(bf16)                                            # (B,T,H)
    lens = jnp.asarray(encoded_lens, jnp.int32)
    mask = jnp.where(jnp.arange(T)[None, :] < lens[:, None],
                     0.0, -1e30)[:, None, :].astype(f32)                          # (B,1,T)
    story_i = story.astype(jnp.int32)[:, None, :]                                 # (B,1,T)

    if use_teacher_forcing:
        # all R decoder inputs are known up front -> precompute and stream over the grid
        tgt = jnp.asarray(target_batches, jnp.int32)                              # (B,S,R)
        if R > 1:
            prev = jnp.moveaxis(tgt[:, :, :R - 1], 2, 0)                          # (R-1,B,S)
            dec_in = jnp.concatenate([x0[None], emb[prev]], axis=0)               # (R,B,S,H)
        else:
            dec_in = x0[None]
        fn = make_decode_fn(R, B, S, T, H, V, Gp)
        all_point, gate_pad, _ = fn(dec_in, h0, enc, mask, story_i, *consts)      # (R,B,S,V)
    else:
        # greedy decode: next input depends on argmax, so step the fused kernel with R=1
        fn = make_decode_fn(1, B, S, T, H, V, Gp)
        x_cur, h_cur = x0, h0
        outs, gate_pad = [], None
        for wi in range(R):
            p_step, g_step, h_cur = fn(x_cur[None], h_cur, enc, mask, story_i, *consts)
            if wi == 0:
                gate_pad = g_step
            outs.append(p_step[0])
            x_cur = emb[jnp.argmax(p_step[0], axis=-1)]
        all_point = jnp.stack(outs, axis=0)                                       # (R,B,S,V)

    all_point_outputs = jnp.transpose(all_point, (2, 1, 0, 3))                    # (S,B,R,V)
    all_gate_outputs = jnp.transpose(gate_pad[:, :, :G], (1, 0, 2))               # (S,B,G)
    # TODO(synk): words_point_out requires lang.index2word string lookup (host-side
    # python dict); returning predicted token indices instead.
    words_point_out = jnp.argmax(all_point_outputs, axis=-1)                      # (S,B,R)
    return all_point_outputs, all_gate_outputs, words_point_out, []


# ----------------------------------------------------------------------------
# Deterministic parameter init + example run
# ----------------------------------------------------------------------------
def init_params(key, vocab_size, hidden_size, nb_gate, n_slot_tokens):
    ks = jax.random.split(key, 19)
    H, V, G = hidden_size, vocab_size, nb_gate
    nrm = lambda k, shape: (0.1 * jax.random.normal(k, shape)).astype(jnp.float32)
    return {
        "embedding": nrm(ks[0], (V, H)),
        "slot_emb": nrm(ks[1], (n_slot_tokens, H)),
        # GRUCell (gate order r, z, n); weights pre-transposed to (H, H) = W^T
        "w_ir": nrm(ks[2], (H, H)), "w_iz": nrm(ks[3], (H, H)), "w_in": nrm(ks[4], (H, H)),
        "w_hr": nrm(ks[5], (H, H)), "w_hz": nrm(ks[6], (H, H)), "w_hn": nrm(ks[7], (H, H)),
        "b_ir": nrm(ks[8], (1, H)), "b_iz": nrm(ks[9], (1, H)), "b_in": nrm(ks[10], (1, H)),
        "b_hr": nrm(ks[11], (1, H)), "b_hz": nrm(ks[12], (1, H)), "b_hn": nrm(ks[13], (1, H)),
        # W_gate: Linear(H, G), pre-transposed
        "w_gate": nrm(ks[14], (H, G)), "b_gate": nrm(ks[15], (1, G)),
        # W_ratio: Linear(3H, 1) split into its three H-wide chunks
        "wr_dec": nrm(ks[16], (1, H)), "wr_ctx": nrm(ks[17], (1, H)), "wr_x": nrm(ks[18], (1, H)),
        "b_ratio": jnp.zeros((1, 1), jnp.float32),
    }


if __name__ == "__main__":
    B, H, T, V, G, R = 2, 32, 8, 64, 3, 4
    slot_temp = ["hotel-pricerange", "hotel-area", "train-day"]
    S = len(slot_temp)

    # build slot_w2i exactly like the module (non-pretrained-domain path)
    slot_w2i = {}
    for slot in slot_temp:
        d, s = slot.split("-")[0], slot.split("-")[1]
        if d not in slot_w2i:
            slot_w2i[d] = len(slot_w2i)
        if s not in slot_w2i:
            slot_w2i[s] = len(slot_w2i)

    key = jax.random.PRNGKey(0)
    k_par, k_h, k_o, k_s, k_t = jax.random.split(key, 5)
    params = init_params(k_par, V, H, G, len(slot_w2i))

    encoded_hidden = jax.random.normal(k_h, (1, B, H), jnp.float32)
    encoded_outputs = jax.random.normal(k_o, (B, T, H), jnp.float32)
    encoded_lens = [T, T - 2]
    story = jax.random.randint(k_s, (B, T), 0, V, jnp.int32)
    target_batches = jax.random.randint(k_t, (B, S, R), 0, V, jnp.int32)

    # teacher-forcing path (fused R-step grid)
    all_point, all_gate, words_idx, _ = generator_forward(
        params, slot_w2i, B, encoded_hidden, encoded_outputs, encoded_lens,
        story, R, target_batches, use_teacher_forcing=True, slot_temp=slot_temp,
    )
    jax.block_until_ready((all_point, all_gate, words_idx))

    assert all_point.shape == (S, B, R, V)
    assert all_gate.shape == (S, B, G)
    assert words_idx.shape == (S, B, R)
    assert bool(jnp.all(jnp.isfinite(all_point)))
    # convex mix of two softmaxes -> rows sum to ~1 (approx reciprocal + bf16 MXU ops)
    assert bool(jnp.allclose(all_point.sum(-1), 1.0, atol=2e-2))

    # greedy (non-teacher-forcing) path, shorter horizon just to exercise it
    gp, gg, gw, _ = generator_forward(
        params, slot_w2i, B, encoded_hidden, encoded_outputs, encoded_lens,
        story, 2, target_batches, use_teacher_forcing=False, slot_temp=slot_temp,
    )
    jax.block_until_ready((gp, gg, gw))
    assert gp.shape == (S, B, 2, V) and gg.shape == (S, B, G)
    assert bool(jnp.all(jnp.isfinite(gp)))

    print("KERNEL_OK")
</pallas_src>

<mosaic_0001>
module attributes {stable_mosaic.version = 11 : i64} {
  func.func @decode_step_kernel(%arg0: i32, %arg1: i32, %arg2: memref<1x1x3x32xf32, #tpu.memory_space<vmem>>, %arg3: memref<1x3x32xf32, #tpu.memory_space<vmem>>, %arg4: memref<1x8x32xbf16, #tpu.memory_space<vmem>>, %arg5: memref<1x1x8xf32, #tpu.memory_space<vmem>>, %arg6: memref<1x1x8xi32, #tpu.memory_space<vmem>>, %arg7: memref<32x64xbf16, #tpu.memory_space<vmem>>, %arg8: memref<32x96xbf16, #tpu.memory_space<vmem>>, %arg9: memref<32x96xbf16, #tpu.memory_space<vmem>>, %arg10: memref<1x96xf32, #tpu.memory_space<vmem>>, %arg11: memref<1x96xf32, #tpu.memory_space<vmem>>, %arg12: memref<32x128xbf16, #tpu.memory_space<vmem>>, %arg13: memref<1x128xf32, #tpu.memory_space<vmem>>, %arg14: memref<1x32xf32, #tpu.memory_space<vmem>>, %arg15: memref<1x32xf32, #tpu.memory_space<vmem>>, %arg16: memref<1x32xf32, #tpu.memory_space<vmem>>, %arg17: memref<1x1xf32, #tpu.memory_space<vmem>>, %arg18: memref<1x1x3x64xf32, #tpu.memory_space<vmem>>, %arg19: memref<1x3x128xf32, #tpu.memory_space<vmem>>, %arg20: memref<1x3x32xf32, #tpu.memory_space<vmem>>, %arg21: memref<3x32xf32, #tpu.memory_space<vmem>>) attributes {dimension_semantics = [#tpu.dimension_semantics<parallel>, #tpu.dimension_semantics<arbitrary>], iteration_bounds = array<i64: 2, 4>, scalar_prefetch = 0 : i64, scratch_operands = 1 : i64, tpu.core_type = #tpu.core_type<tc>, window_params = [{transform_indices = @transform_0, window_bounds = array<i64: 1, 1, 3, 32>}, {transform_indices = @transform_1, window_bounds = array<i64: 1, 3, 32>}, {transform_indices = @transform_2, window_bounds = array<i64: 1, 8, 32>}, {transform_indices = @transform_3, window_bounds = array<i64: 1, 1, 8>}, {transform_indices = @transform_4, window_bounds = array<i64: 1, 1, 8>}, {pipeline_mode = #tpu.pipeline_mode<synchronous>, transform_indices = @transform_5, window_bounds = array<i64: 32, 64>}, {pipeline_mode = #tpu.pipeline_mode<synchronous>, transform_indices = @transform_6, window_bounds = array<i64: 32, 96>}, {pipeline_mode = #tpu.pipeline_mode<synchronous>, transform_indices = @transform_7, window_bounds = array<i64: 32, 96>}, {pipeline_mode = #tpu.pipeline_mode<synchronous>, transform_indices = @transform_8, window_bounds = array<i64: 1, 96>}, {pipeline_mode = #tpu.pipeline_mode<synchronous>, transform_indices = @transform_9, window_bounds = array<i64: 1, 96>}, {pipeline_mode = #tpu.pipeline_mode<synchronous>, transform_indices = @transform_10, window_bounds = array<i64: 32, 128>}, {pipeline_mode = #tpu.pipeline_mode<synchronous>, transform_indices = @transform_11, window_bounds = array<i64: 1, 128>}, {pipeline_mode = #tpu.pipeline_mode<synchronous>, transform_indices = @transform_12, window_bounds = array<i64: 1, 32>}, {pipeline_mode = #tpu.pipeline_mode<synchronous>, transform_indices = @transform_13, window_bounds = array<i64: 1, 32>}, {pipeline_mode = #tpu.pipeline_mode<synchronous>, transform_indices = @transform_14, window_bounds = array<i64: 1, 32>}, {pipeline_mode = #tpu.pipeline_mode<synchronous>, transform_indices = @transform_15, window_bounds = array<i64: 1, 1>}, {transform_indices = @transform_16, window_bounds = array<i64: 1, 1, 3, 64>}, {transform_indices = @transform_17, window_bounds = array<i64: 1, 3, 128>}, {transform_indices = @transform_18, window_bounds = array<i64: 1, 3, 32>}]} {
    %c0_i32 = arith.constant 0 : i32
    %0 = arith.cmpi eq, %arg1, %c0_i32 : i32
    %1 = arith.extui %0 : i1 to i32
    %c0_i32_0 = arith.constant 0 : i32
    %2 = arith.cmpi ne, %1, %c0_i32_0 : i32
    scf.if %2 {
      %c0_59 = arith.constant 0 : index
      %c0_60 = arith.constant 0 : index
      %c0_61 = arith.constant 0 : index
      %130 = vector.load %arg3[%c0_59, %c0_60, %c0_61] : memref<1x3x32xf32, #tpu.memory_space<vmem>>, vector<1x3x32xf32>
      %131 = vector.shape_cast %130 : vector<1x3x32xf32> to vector<3x32xf32>
      %c0_62 = arith.constant 0 : index
      %c0_63 = arith.constant 0 : index
      %132 = vector.load %arg21[%c0_62, %c0_63] : memref<3x32xf32, #tpu.memory_space<vmem>>, vector<3x32xf32>
      tpu.vector_store %arg21[%c0_62, %c0_63], %131 {strides = array<i32>} : memref<3x32xf32, #tpu.memory_space<vmem>>, vector<3x32xf32>,
    } else {
    }
    %c0 = arith.constant 0 : index
    %c0_1 = arith.constant 0 : index
    %c0_2 = arith.constant 0 : index
    %c0_3 = arith.constant 0 : index
    %3 = vector.load %arg2[%c0, %c0_1, %c0_2, %c0_3] : memref<1x1x3x32xf32, #tpu.memory_space<vmem>>, vector<1x1x3x32xf32>
    %4 = vector.shape_cast %3 : vector<1x1x3x32xf32> to vector<3x32xf32>
    %c0_4 = arith.constant 0 : index
    %c0_5 = arith.constant 0 : index
    %5 = vector.load %arg21[%c0_4, %c0_5] : memref<3x32xf32, #tpu.memory_space<vmem>>, vector<3x32xf32>
    %6 = arith.truncf %4 : vector<3x32xf32> to vector<3x32xbf16>
    %c0_6 = arith.constant 0 : index
    %c0_7 = arith.constant 0 : index
    %7 = vector.load %arg8[%c0_6, %c0_7] : memref<32x96xbf16, #tpu.memory_space<vmem>>, vector<32x96xbf16>
    %cst = arith.constant dense<0.000000e+00> : vector<3x96xf32>
    %8 = tpu.matmul %6, %7, %cst {dimension_numbers = #tpu.dot_dimension_numbers<[1], [0], [0], [1], [0, 0, 1, 1], [], []>} : vector<3x32xbf16>, vector<32x96xbf16>, vector<3x96xf32> -> vector<3x96xf32>
    %c0_8 = arith.constant 0 : index
    %c0_9 = arith.constant 0 : index
    %9 = vector.load %arg10[%c0_8, %c0_9] : memref<1x96xf32, #tpu.memory_space<vmem>>, vector<1x96xf32>
    %10 = vector.broadcast %9 : vector<1x96xf32> to vector<3x96xf32>
    %11 = arith.addf %8, %10 : vector<3x96xf32>
    %12 = arith.truncf %5 : vector<3x32xf32> to vector<3x32xbf16>
    %c0_10 = arith.constant 0 : index
    %c0_11 = arith.constant 0 : index
    %13 = vector.load %arg9[%c0_10, %c0_11] : memref<32x96xbf16, #tpu.memory_space<vmem>>, vector<32x96xbf16>
    %cst_12 = arith.constant dense<0.000000e+00> : vector<3x96xf32>
    %14 = tpu.matmul %12, %13, %cst_12 {dimension_numbers = #tpu.dot_dimension_numbers<[1], [0], [0], [1], [0, 0, 1, 1], [], []>} : vector<3x32xbf16>, vector<32x96xbf16>, vector<3x96xf32> -> vector<3x96xf32>
    %c0_13 = arith.constant 0 : index
    %c0_14 = arith.constant 0 : index
    %15 = vector.load %arg11[%c0_13, %c0_14] : memref<1x96xf32, #tpu.memory_space<vmem>>, vector<1x96xf32>
    %16 = vector.broadcast %15 : vector<1x96xf32> to vector<3x96xf32>
    %17 = arith.addf %14, %16 : vector<3x96xf32>
    %18 = vector.extract_strided_slice %11 {offsets = [0, 0], sizes = [3, 32], strides = [1, 1]} : vector<3x96xf32> to vector<3x32xf32>
    %19 = vector.extract_strided_slice %17 {offsets = [0, 0], sizes = [3, 32], strides = [1, 1]} : vector<3x96xf32> to vector<3x32xf32>
    %20 = arith.addf %18, %19 : vector<3x32xf32>
    %21 = arith.negf %20 : vector<3x32xf32>
    %22 = math.exp %21 : vector<3x32xf32>
    %cst_15 = arith.constant 1.000000e+00 : f32
    %23 = vector.broadcast %cst_15 : f32 to vector<3x32xf32>
    %24 = arith.addf %23, %22 : vector<3x32xf32>
    %25 = arith.divf %23, %24 : vector<3x32xf32>
    %26 = vector.extract_strided_slice %11 {offsets = [0, 32], sizes = [3, 32], strides = [1, 1]} : vector<3x96xf32> to vector<3x32xf32>
    %27 = vector.extract_strided_slice %17 {offsets = [0, 32], sizes = [3, 32], strides = [1, 1]} : vector<3x96xf32> to vector<3x32xf32>
    %28 = arith.addf %26, %27 : vector<3x32xf32>
    %29 = arith.negf %28 : vector<3x32xf32>
    %30 = math.exp %29 : vector<3x32xf32>
    %cst_16 = arith.constant 1.000000e+00 : f32
    %31 = vector.broadcast %cst_16 : f32 to vector<3x32xf32>
    %32 = arith.addf %31, %30 : vector<3x32xf32>
    %33 = arith.divf %31, %32 : vector<3x32xf32>
    %34 = vector.extract_strided_slice %11 {offsets = [0, 64], sizes = [3, 32], strides = [1, 1]} : vector<3x96xf32> to vector<3x32xf32>
    %35 = vector.extract_strided_slice %17 {offsets = [0, 64], sizes = [3, 32], strides = [1, 1]} : vector<3x96xf32> to vector<3x32xf32>
    %36 = arith.mulf %25, %35 : vector<3x32xf32>
    %37 = arith.addf %34, %36 : vector<3x32xf32>
    %38 = math.tanh %37 : vector<3x32xf32>
    %cst_17 = arith.constant 1.000000e+00 : f32
    %39 = vector.broadcast %cst_17 : f32 to vector<3x32xf32>
    %40 = arith.subf %39, %33 : vector<3x32xf32>
    %41 = arith.mulf %40, %38 : vector<3x32xf32>
    %42 = arith.mulf %33, %5 : vector<3x32xf32>
    %43 = arith.addf %41, %42 : vector<3x32xf32>
    %c0_18 = arith.constant 0 : index
    %c0_19 = arith.constant 0 : index
    %c0_20 = arith.constant 0 : index
    %44 = vector.load %arg4[%c0_18, %c0_19, %c0_20] : memref<1x8x32xbf16, #tpu.memory_space<vmem>>, vector<1x8x32xbf16>
    %45 = vector.shape_cast %44 : vector<1x8x32xbf16> to vector<8x32xbf16>
    %46 = arith.truncf %43 : vector<3x32xf32> to vector<3x32xbf16>
    %cst_21 = arith.constant dense<0.000000e+00> : vector<3x8xf32>
    %47 = tpu.matmul %46, %45, %cst_21 {dimension_numbers = #tpu.dot_dimension_numbers<[1], [1], [0], [0], [0, 0, 1, 0], [], []>} : vector<3x32xbf16>, vector<8x32xbf16>, vector<3x8xf32> -> vector<3x8xf32>
    %c0_22 = arith.constant 0 : index
    %c0_23 = arith.constant 0 : index
    %c0_24 = arith.constant 0 : index
    %48 = vector.load %arg5[%c0_22, %c0_23, %c0_24] : memref<1x1x8xf32, #tpu.memory_space<vmem>>, vector<1x1x8xf32>
    %49 = vector.shape_cast %48 : vector<1x1x8xf32> to vector<1x8xf32>
    %50 = vector.broadcast %49 : vector<1x8xf32> to vector<3x8xf32>
    %51 = arith.addf %47, %50 : vector<3x8xf32>
    %cst_25 = arith.constant dense<0xFF800000> : vector<3xf32>
    %52 = vector.multi_reduction <maximumf>, %51, %cst_25 [1] : vector<3x8xf32> to vector<3xf32>
    %53 = vector.shape_cast %52 : vector<3xf32> to vector<3x1xf32>
    %54 = vector.broadcast %53 : vector<3x1xf32> to vector<3x8xf32>
    %55 = arith.subf %51, %54 : vector<3x8xf32>
    %56 = math.exp %55 : vector<3x8xf32>
    %cst_26 = arith.constant dense<0.000000e+00> : vector<3xf32>
    %57 = vector.multi_reduction <add>, %56, %cst_26 [1] : vector<3x8xf32> to vector<3xf32>
    %58 = vector.shape_cast %57 : vector<3xf32> to vector<3x1xf32>
    %59 = tpu.reciprocal %58 {approx = true} : vector<3x1xf32> -> vector<3x1xf32>
    %60 = vector.broadcast %59 : vector<3x1xf32> to vector<3x8xf32>
    %61 = arith.mulf %56, %60 : vector<3x8xf32>
    %62 = arith.truncf %61 : vector<3x8xf32> to vector<3x8xbf16>
    %cst_27 = arith.constant dense<0.000000e+00> : vector<3x32xf32>
    %63 = tpu.matmul %62, %45, %cst_27 {dimension_numbers = #tpu.dot_dimension_numbers<[1], [0], [0], [1], [0, 0, 1, 1], [], []>} : vector<3x8xbf16>, vector<8x32xbf16>, vector<3x32xf32> -> vector<3x32xf32>
    %c0_i32_28 = arith.constant 0 : i32
    %64 = arith.cmpi eq, %arg1, %c0_i32_28 : i32
    %65 = arith.extui %64 : i1 to i32
    %c0_i32_29 = arith.constant 0 : i32
    %66 = arith.cmpi ne, %65, %c0_i32_29 : i32
    scf.if %66 {
      %130 = arith.truncf %63 : vector<3x32xf32> to vector<3x32xbf16>
      %c0_59 = arith.constant 0 : index
      %c0_60 = arith.constant 0 : index
      %131 = vector.load %arg12[%c0_59, %c0_60] : memref<32x128xbf16, #tpu.memory_space<vmem>>, vector<32x128xbf16>
      %cst_61 = arith.constant dense<0.000000e+00> : vector<3x128xf32>
      %132 = tpu.matmul %130, %131, %cst_61 {dimension_numbers = #tpu.dot_dimension_numbers<[1], [0], [0], [1], [0, 0, 1, 1], [], []>} : vector<3x32xbf16>, vector<32x128xbf16>, vector<3x128xf32> -> vector<3x128xf32>
      %c0_62 = arith.constant 0 : index
      %c0_63 = arith.constant 0 : index
      %133 = vector.load %arg13[%c0_62, %c0_63] : memref<1x128xf32, #tpu.memory_space<vmem>>, vector<1x128xf32>
      %134 = vector.broadcast %133 : vector<1x128xf32> to vector<3x128xf32>
      %135 = arith.addf %132, %134 : vector<3x128xf32>
      %c0_64 = arith.constant 0 : index
      %c0_65 = arith.constant 0 : index
      %c0_66 = arith.constant 0 : index
      %136 = vector.load %arg19[%c0_64, %c0_65, %c0_66] : memref<1x3x128xf32, #tpu.memory_space<vmem>>, vector<1x3x128xf32>
      %137 = vector.shape_cast %136 : vector<1x3x128xf32> to vector<3x128xf32>
      %138 = vector.shape_cast %135 : vector<3x128xf32> to vector<1x3x128xf32>
      tpu.vector_store %arg19[%c0_64, %c0_65, %c0_66], %138 {strides = array<i32>} : memref<1x3x128xf32, #tpu.memory_space<vmem>>, vector<1x3x128xf32>,
    } else {
    }
    %67 = arith.truncf %43 : vector<3x32xf32> to vector<3x32xbf16>
    %c0_30 = arith.constant 0 : index
    %c0_31 = arith.constant 0 : index
    %68 = vector.load %arg7[%c0_30, %c0_31] : memref<32x64xbf16, #tpu.memory_space<vmem>>, vector<32x64xbf16>
    %cst_32 = arith.constant dense<0.000000e+00> : vector<3x64xf32>
    %69 = tpu.matmul %67, %68, %cst_32 {dimension_numbers = #tpu.dot_dimension_numbers<[1], [0], [0], [1], [0, 0, 1, 1], [], []>} : vector<3x32xbf16>, vector<32x64xbf16>, vector<3x64xf32> -> vector<3x64xf32>
    %cst_33 = arith.constant dense<0xFF800000> : vector<3xf32>
    %70 = vector.multi_reduction <maximumf>, %69, %cst_33 [1] : vector<3x64xf32> to vector<3xf32>
    %71 = vector.shape_cast %70 : vector<3xf32> to vector<3x1xf32>
    %72 = vector.broadcast %71 : vector<3x1xf32> to vector<3x64xf32>
    %73 = arith.subf %69, %72 : vector<3x64xf32>
    %74 = math.exp %73 : vector<3x64xf32>
    %cst_34 = arith.constant dense<0.000000e+00> : vector<3xf32>
    %75 = vector.multi_reduction <add>, %74, %cst_34 [1] : vector<3x64xf32> to vector<3xf32>
    %76 = vector.shape_cast %75 : vector<3xf32> to vector<3x1xf32>
    %77 = tpu.reciprocal %76 {approx = true} : vector<3x1xf32> -> vector<3x1xf32>
    %78 = vector.broadcast %77 : vector<3x1xf32> to vector<3x64xf32>
    %79 = arith.mulf %74, %78 : vector<3x64xf32>
    %c0_35 = arith.constant 0 : index
    %c0_36 = arith.constant 0 : index
    %80 = vector.load %arg14[%c0_35, %c0_36] : memref<1x32xf32, #tpu.memory_space<vmem>>, vector<1x32xf32>
    %81 = vector.broadcast %80 : vector<1x32xf32> to vector<3x32xf32>
    %82 = arith.mulf %43, %81 : vector<3x32xf32>
    %cst_37 = arith.constant dense<0.000000e+00> : vector<3xf32>
    %83 = vector.multi_reduction <add>, %82, %cst_37 [1] : vector<3x32xf32> to vector<3xf32>
    %84 = vector.shape_cast %83 : vector<3xf32> to vector<3x1xf32>
    %c0_38 = arith.constant 0 : index
    %c0_39 = arith.constant 0 : index
    %85 = vector.load %arg15[%c0_38, %c0_39] : memref<1x32xf32, #tpu.memory_space<vmem>>, vector<1x32xf32>
    %86 = vector.broadcast %85 : vector<1x32xf32> to vector<3x32xf32>
    %87 = arith.mulf %63, %86 : vector<3x32xf32>
    %cst_40 = arith.constant dense<0.000000e+00> : vector<3xf32>
    %88 = vector.multi_reduction <add>, %87, %cst_40 [1] : vector<3x32xf32> to vector<3xf32>
    %89 = vector.shape_cast %88 : vector<3xf32> to vector<3x1xf32>
    %90 = arith.addf %84, %89 : vector<3x1xf32>
    %c0_41 = arith.constant 0 : index
    %c0_42 = arith.constant 0 : index
    %91 = vector.load %arg16[%c0_41, %c0_42] : memref<1x32xf32, #tpu.memory_space<vmem>>, vector<1x32xf32>
    %92 = vector.broadcast %91 : vector<1x32xf32> to vector<3x32xf32>
    %93 = arith.mulf %4, %92 : vector<3x32xf32>
    %cst_43 = arith.constant dense<0.000000e+00> : vector<3xf32>
    %94 = vector.multi_reduction <add>, %93, %cst_43 [1] : vector<3x32xf32> to vector<3xf32>
    %95 = vector.shape_cast %94 : vector<3xf32> to vector<3x1xf32>
    %96 = arith.addf %90, %95 : vector<3x1xf32>
    %c0_44 = arith.constant 0 : index
    %c0_45 = arith.constant 0 : index
    %97 = vector.load %arg17[%c0_44, %c0_45] : memref<1x1xf32, #tpu.memory_space<vmem>>, vector<1x1xf32>
    %98 = vector.broadcast %97 : vector<1x1xf32> to vector<3x1xf32>
    %99 = arith.addf %96, %98 : vector<3x1xf32>
    %100 = arith.negf %99 : vector<3x1xf32>
    %101 = math.exp %100 : vector<3x1xf32>
    %cst_46 = arith.constant 1.000000e+00 : f32
    %102 = vector.broadcast %cst_46 : f32 to vector<3x1xf32>
    %103 = arith.addf %102, %101 : vector<3x1xf32>
    %104 = arith.divf %102, %103 : vector<3x1xf32>
    %c0_47 = arith.constant 0 : index
    %c0_48 = arith.constant 0 : index
    %c0_49 = arith.constant 0 : index
    %105 = vector.load %arg6[%c0_47, %c0_48, %c0_49] : memref<1x1x8xi32, #tpu.memory_space<vmem>>, vector<1x1x8xi32>
    %106 = vector.shape_cast %105 : vector<1x1x8xi32> to vector<1x8xi32>
    %107 = vector.shape_cast %106 : vector<1x8xi32> to vector<1x8x1xi32>
    %108 = tpu.iota {dimensions = array<i32: 2>} : vector<1x1x64xi32>
    %109 = vector.broadcast %107 : vector<1x8x1xi32> to vector<1x8x64xi32>
    %110 = vector.broadcast %108 : vector<1x1x64xi32> to vector<1x8x64xi32>
    %111 = arith.cmpi eq, %109, %110 : vector<1x8x64xi32>
    %112 = arith.extui %111 : vector<1x8x64xi1> to vector<1x8x64xi32>
    %113 = arith.sitofp %112 : vector<1x8x64xi32> to vector<1x8x64xf32>
    %114 = vector.shape_cast %113 : vector<1x8x64xf32> to vector<8x64xf32>
    %cst_50 = arith.constant dense<0.000000e+00> : vector<3x64xf32>
    %115 = tpu.matmul %61, %114, %cst_50 {dimension_numbers = #tpu.dot_dimension_numbers<[1], [0], [0], [1], [0, 0, 1, 1], [], []>} : vector<3x8xf32>, vector<8x64xf32>, vector<3x64xf32> -> vector<3x64xf32>
    %cst_51 = arith.constant 1.000000e+00 : f32
    %116 = vector.broadcast %cst_51 : f32 to vector<3x1xf32>
    %117 = arith.subf %116, %104 : vector<3x1xf32>
    %118 = vector.broadcast %117 : vector<3x1xf32> to vector<3x64xf32>
    %119 = arith.mulf %118, %115 : vector<3x64xf32>
    %120 = vector.broadcast %104 : vector<3x1xf32> to vector<3x64xf32>
    %121 = arith.mulf %120, %79 : vector<3x64xf32>
    %122 = arith.addf %119, %121 : vector<3x64xf32>
    %c0_52 = arith.constant 0 : index
    %c0_53 = arith.constant 0 : index
    %c0_54 = arith.constant 0 : index
    %c0_55 = arith.constant 0 : index
    %123 = vector.load %arg18[%c0_52, %c0_53, %c0_54, %c0_55] : memref<1x1x3x64xf32, #tpu.memory_space<vmem>>, vector<1x1x3x64xf32>
    %124 = vector.shape_cast %123 : vector<1x1x3x64xf32> to vector<3x64xf32>
    %125 = vector.shape_cast %122 : vector<3x64xf32> to vector<1x1x3x64xf32>
    tpu.vector_store %arg18[%c0_52, %c0_53, %c0_54, %c0_55], %125 {strides = array<i32>} : memref<1x1x3x64xf32, #tpu.memory_space<vmem>>, vector<1x1x3x64xf32>,
    %c0_56 = arith.constant 0 : index
    %c0_57 = arith.constant 0 : index
    %126 = vector.load %arg21[%c0_56, %c0_57] : memref<3x32xf32, #tpu.memory_space<vmem>>, vector<3x32xf32>
    tpu.vector_store %arg21[%c0_56, %c0_57], %43 {strides = array<i32>} : memref<3x32xf32, #tpu.memory_space<vmem>>, vector<3x32xf32>,
    %c3_i32 = arith.constant 3 : i32
    %127 = arith.cmpi eq, %arg1, %c3_i32 : i32
    %128 = arith.extui %127 : i1 to i32
    %c0_i32_58 = arith.constant 0 : i32
    %129 = arith.cmpi ne, %128, %c0_i32_58 : i32
    scf.if %129 {
      %c0_59 = arith.constant 0 : index
      %c0_60 = arith.constant 0 : index
      %c0_61 = arith.constant 0 : index
      %130 = vector.load %arg20[%c0_59, %c0_60, %c0_61] : memref<1x3x32xf32, #tpu.memory_space<vmem>>, vector<1x3x32xf32>
      %131 = vector.shape_cast %130 : vector<1x3x32xf32> to vector<3x32xf32>
      %132 = vector.shape_cast %43 : vector<3x32xf32> to vector<1x3x32xf32>
      tpu.vector_store %arg20[%c0_59, %c0_60, %c0_61], %132 {strides = array<i32>} : memref<1x3x32xf32, #tpu.memory_space<vmem>>, vector<1x3x32xf32>,
    } else {
    }
    return
  }
  func.func @transform_0(%arg0: i32, %arg1: i32) -> (i32, i32, i32, i32) {
    %c0_i32 = arith.constant 0 : i32
    %c0_i32_0 = arith.constant 0 : i32
    %c0_i32_1 = arith.constant 0 : i32
    return %arg1, %arg0, %c0_i32, %c0_i32_0 : i32, i32, i32, i32
  }
  func.func @transform_1(%arg0: i32, %arg1: i32) -> (i32, i32, i32) {
    %c0_i32 = arith.constant 0 : i32
    %c0_i32_0 = arith.constant 0 : i32
    %c0_i32_1 = arith.constant 0 : i32
    return %arg0, %c0_i32, %c0_i32_0 : i32, i32, i32
  }
  func.func @transform_2(%arg0: i32, %arg1: i32) -> (i32, i32, i32) {
    %c0_i32 = arith.constant 0 : i32
    %c0_i32_0 = arith.constant 0 : i32
    %c0_i32_1 = arith.constant 0 : i32
    return %arg0, %c0_i32, %c0_i32_0 : i32, i32, i32
  }
  func.func @transform_3(%arg0: i32, %arg1: i32) -> (i32, i32, i32) {
    %c0_i32 = arith.constant 0 : i32
    %c0_i32_0 = arith.constant 0 : i32
    %c0_i32_1 = arith.constant 0 : i32
    return %arg0, %c0_i32, %c0_i32_0 : i32, i32, i32
  }
  func.func @transform_4(%arg0: i32, %arg1: i32) -> (i32, i32, i32) {
    %c0_i32 = arith.constant 0 : i32
    %c0_i32_0 = arith.constant 0 : i32
    %c0_i32_1 = arith.constant 0 : i32
    return %arg0, %c0_i32, %c0_i32_0 : i32, i32, i32
  }
  func.func @transform_5(%arg0: i32, %arg1: i32) -> (i32, i32) {
    %c0_i32 = arith.constant 0 : i32
    %c0_i32_0 = arith.constant 0 : i32
    %c0_i32_1 = arith.constant 0 : i32
    return %c0_i32, %c0_i32_0 : i32, i32
  }
  func.func @transform_6(%arg0: i32, %arg1: i32) -> (i32, i32) {
    %c0_i32 = arith.constant 0 : i32
    %c0_i32_0 = arith.constant 0 : i32
    %c0_i32_1 = arith.constant 0 : i32
    return %c0_i32, %c0_i32_0 : i32, i32
  }
  func.func @transform_7(%arg0: i32, %arg1: i32) -> (i32, i32) {
    %c0_i32 = arith.constant 0 : i32
    %c0_i32_0 = arith.constant 0 : i32
    %c0_i32_1 = arith.constant 0 : i32
    return %c0_i32, %c0_i32_0 : i32, i32
  }
  func.func @transform_8(%arg0: i32, %arg1: i32) -> (i32, i32) {
    %c0_i32 = arith.constant 0 : i32
    %c0_i32_0 = arith.constant 0 : i32
    %c0_i32_1 = arith.constant 0 : i32
    return %c0_i32, %c0_i32_0 : i32, i32
  }
  func.func @transform_9(%arg0: i32, %arg1: i32) -> (i32, i32) {
    %c0_i32 = arith.constant 0 : i32
    %c0_i32_0 = arith.constant 0 : i32
    %c0_i32_1 = arith.constant 0 : i32
    return %c0_i32, %c0_i32_0 : i32, i32
  }
  func.func @transform_10(%arg0: i32, %arg1: i32) -> (i32, i32) {
    %c0_i32 = arith.constant 0 : i32
    %c0_i32_0 = arith.constant 0 : i32
    %c0_i32_1 = arith.constant 0 : i32
    return %c0_i32, %c0_i32_0 : i32, i32
  }
  func.func @transform_11(%arg0: i32, %arg1: i32) -> (i32, i32) {
    %c0_i32 = arith.constant 0 : i32
    %c0_i32_0 = arith.constant 0 : i32
    %c0_i32_1 = arith.constant 0 : i32
    return %c0_i32, %c0_i32_0 : i32, i32
  }
  func.func @transform_12(%arg0: i32, %arg1: i32) -> (i32, i32) {
    %c0_i32 = arith.constant 0 : i32
    %c0_i32_0 = arith.constant 0 : i32
    %c0_i32_1 = arith.constant 0 : i32
    return %c0_i32, %c0_i32_0 : i32, i32
  }
  func.func @transform_13(%arg0: i32, %arg1: i32) -> (i32, i32) {
    %c0_i32 = arith.constant 0 : i32
    %c0_i32_0 = arith.constant 0 : i32
    %c0_i32_1 = arith.constant 0 : i32
    return %c0_i32, %c0_i32_0 : i32, i32
  }
  func.func @transform_14(%arg0: i32, %arg1: i32) -> (i32, i32) {
    %c0_i32 = arith.constant 0 : i32
    %c0_i32_0 = arith.constant 0 : i32
    %c0_i32_1 = arith.constant 0 : i32
    return %c0_i32, %c0_i32_0 : i32, i32
  }
  func.func @transform_15(%arg0: i32, %arg1: i32) -> (i32, i32) {
    %c0_i32 = arith.constant 0 : i32
    %c0_i32_0 = arith.constant 0 : i32
    %c0_i32_1 = arith.constant 0 : i32
    return %c0_i32, %c0_i32_0 : i32, i32
  }
  func.func @transform_16(%arg0: i32, %arg1: i32) -> (i32, i32, i32, i32) {
    %c0_i32 = arith.constant 0 : i32
    %c0_i32_0 = arith.constant 0 : i32
    %c0_i32_1 = arith.constant 0 : i32
    return %arg1, %arg0, %c0_i32, %c0_i32_0 : i32, i32, i32, i32
  }
  func.func @transform_17(%arg0: i32, %arg1: i32) -> (i32, i32, i32) {
    %c0_i32 = arith.constant 0 : i32
    %c0_i32_0 = arith.constant 0 : i32
    %c0_i32_1 = arith.constant 0 : i32
    return %arg0, %c0_i32, %c0_i32_0 : i32, i32, i32
  }
  func.func @transform_18(%arg0: i32, %arg1: i32) -> (i32, i32, i32) {
    %c0_i32 = arith.constant 0 : i32
    %c0_i32_0 = arith.constant 0 : i32
    %c0_i32_1 = arith.constant 0 : i32
    return %arg0, %c0_i32, %c0_i32_0 : i32, i32, i32
  }
}

</mosaic_0001>

<bundles_post_ra>
// kernel: tpu_custom_call.1
= control target key start
LH: loop header
LB: loop body
LE: loop exit
PB: predicated region body
PF: predicated region fallthrough
CT: control target
= control target key end

     0   :  { %s1818_s29 = smov 0   ;;  %s1820_s30 = smov 0   ;;  %s2037_s0 = inlined_call_operand.vmem [shape: f32[4,2,3,32], index: 0, kind: input, shape index: {}]   ;;  %s2038_s1 = inlined_call_operand.vmem [shape: f32[2,3,32], index: 1, kind: input, shape index: {}]   ;;  %s2039_s2 = inlined_call_operand.vmem [shape: bf16[2,8,32], index: 2, kind: input, shape index: {}]   ;;  %s2040_s3 = inlined_call_operand.vmem [shape: f32[2,1,8], index: 3, kind: input, shape index: {}]   ;;  %s2041_s4 = inlined_call_operand.vmem [shape: s32[2,1,8], index: 4, kind: input, shape index: {}]   ;;  %s2042_s5 = inlined_call_operand.vmem [shape: bf16[32,64], index: 5, kind: input, shape index: {}]   ;;  %s2043_s6 = inlined_call_operand.vmem [shape: bf16[32,96], index: 6, kind: input, shape index: {}]   ;;  %s2044_s7 = inlined_call_operand.vmem [shape: bf16[32,96], index: 7, kind: input, shape index: {}]   ;;  %s2045_s8 = inlined_call_operand.vmem [shape: f32[1,96], index: 8, kind: input, shape index: {}]   ;;  %s2046_s9 = inlined_call_operand.vmem [shape: f32[1,96], index: 9, kind: input, shape index: {}]   ;;  %s2047_s10 = inlined_call_operand.vmem [shape: bf16[32,128], index: 10, kind: input, shape index: {}]   ;;  %s2048_s11 = inlined_call_operand.vmem [shape: f32[1,128], index: 11, kind: input, shape index: {}]   ;;  %s2049_s12 = inlined_call_operand.vmem [shape: f32[1,32], index: 12, kind: input, shape index: {}]   ;;  %s2050_s13 = inlined_call_operand.vmem [shape: f32[1,32], index: 13, kind: input, shape index: {}]   ;;  %s2051_s14 = inlined_call_operand.vmem [shape: f32[1,32], index: 14, kind: input, shape index: {}]   ;;  %s2052_s15 = inlined_call_operand.<no memory space> [shape: f32[1,1], index: 15, kind: input, shape index: {}]   ;;  %s2053_s16 = inlined_call_operand.vmem [shape: f32[4,2,3,64], index: 16, kind: output, shape index: {0}]   ;;  %s2054_s17 = inlined_call_operand.vmem [shape: f32[2,3,128], index: 17, kind: output, shape index: {1}]   ;;  %s2055_s18 = inlined_call_operand.vmem [shape: f32[2,3,32], index: 18, kind: output, shape index: {2}]  }
   0x1   :  { %2061 = sst [smem:[#allocation9_spill]] %s2037_s0  ;;  %v24_v0 = vstv %s2052_s15  ;;  %s1822_s0 = smov 0  }
   0x2   :  { %2062 = sst [smem:[#allocation10_spill]] %s2038_s1  ;;  %25 = vst [vmem:[#allocation3] sm:$0x1] %v24_v0  ;;  %s1824_s19 = smov 0  }
   0x3   :  { %2063 = sst [smem:[#allocation11_spill]] %s2039_s2  ;;  %s1826_s1 = smov 0  }
   0x4   :  { %2064 = sst [smem:[#allocation12_spill]] %s2042_s5 }
   0x5   :  { %2065 = sst [smem:[#allocation13_spill]] %s2045_s8 }
   0x6   :  { %2066 = sst [smem:[#allocation14_spill]] %s2046_s9 }
   0x7   :  { %2067 = sst [smem:[#allocation15_spill]] %s2047_s10 }
   0x8   :  { %2068 = sst [smem:[#allocation16_spill]] %s2048_s11 }
   0x9   :  { %2069 = sst [smem:[#allocation17_spill]] %s2049_s12 }
   0xa   :  { %2070 = sst [smem:[#allocation18_spill]] %s2050_s13 }
   0xb   :  { %2071 = sst [smem:[#allocation19_spill]] %s2051_s14 }
   0xc LB: > { %2072 = sst [smem:[#allocation4_spill]] %s1701_s0  ;;  %s40_s15 = sadd.s32 1, %s1701_s0  ;;  %s1709_s1 = sphi %s1826_s1, %s31_s1   ;;  %s1705_s19 = sphi %s1824_s19, %s2093_s19   ;;  %s1701_s0 = sphi %s1822_s0, %s2092_s0   ;;  %s1697_s30 = sphi %s1820_s30, %s2091_s30   ;;  %s1693_s29 = sphi %s1818_s29, %s2090_s29  }
   0xd   : > { %2073 = sst [smem:[#allocation5_spill]] %s1705_s19  ;;  %s43_s20 = sadd.s32 1, %s1705_s19 }
   0xe   : > { %2074 = sst [smem:[#allocation6_spill]] %s1709_s1  ;;  %p41_p0 = scmp.ge.s32.totalorder %s40_s15, 4 }
   0xf   : > { %p1485_p1 = scmp.ge.s32.totalorder %s1709_s1, 1  ;;  %p572_p2 = scmp.lt.s32.totalorder %s1709_s1, 9 }
  0x10   : > { %s2095_s15 = smov (%p41_p0, %s40_s15), 0  ;;  %s2097_s20 = smov (!%p41_p0, %s43_s20), %s1705_s19 }
  0x11   : > { %2075 = sst [smem:[#allocation7_spill]] %s2095_s15  ;;  %p573_p3 = pnand %p1485_p1, %p572_p2 }
  0x12   : > { %p45_p4 = scmp.ge.s32.totalorder %s2097_s20, 2  ;;  %p654_p5 = scmp.lt.s32.totalorder (!%p573_p3), %s1693_s29, 3 }
  0x13   : > { %576 = sbr.rel (%p573_p3) target bundleno = 2256 (0x8d0), region = 84  ;;  %p656_p6 = scmp.lt.s32.totalorder (!%p573_p3), %s1697_s30, 1 }
  0x14   : > { %s2099_s20 = smov (%p45_p4, %s2097_s20), 0  ;;  %s2077_s27 = sld [smem:[#allocation10_spill]] (!%p573_p3) }
  0x15   : > { %2076 = sst [smem:[#allocation8_spill]] %s2099_s20  ;;  %s2078_s19 = sld [smem:[#allocation9_spill]] (!%p573_p3) }
  0x16   : > { %s2079_s14 = sld [smem:[#allocation11_spill]] (!%p573_p3)  ;;  %p1494_p7 = scmp.ne.s32.totalorder (!%p573_p3), %s1693_s29, 0 }
  0x1a   : > { %s655_s21 = scalar_select %p654_p5, %s1693_s29, 3 }
  0x1b   : > { %s2101_s30 = smov (!%p656_p6, %s1697_s30), 1  ;;  %696 = sbr.rel (%p1494_p7) target bundleno = 34 (0x22), region = 88 }
  0x1c   : > { %s1486_s22 = sshll.u32 %s655_s21, 1  ;;  %s1856_s23 = sshll.u32 %s2101_s30, 2  ;;  %vm698_vm0 = vcmask (!%p1494_p7), 256000  }
  0x1d   : > { %s659_s2 = sadd.s32 %s1486_s22, %s2101_s30  ;;  %s665_s28 = scalar_lea.vmem %s2077_s27, %s1856_s23 }
  0x1e   : > { %s1487_s24 = sshll.u32 %s659_s2, 2  ;;  %s669_s21 = scalar_lea.vmem %s2079_s14, %s1856_s23  ;;  %v697_v1 = vld [vmem:[%s665_s28] sm:$0x7] (!%p1494_p7) }
  0x1f   : > { %s661_s0 = scalar_lea.vmem %s2078_s19, %s1487_s24  ;;  %s672_s12 = scalar_lea.vmem %s2040_s3, %s2101_s30  ;;  %699 = vst.msk [vmem:[#allocation2] sm:$0x7] (!%p1494_p7), %vm698_vm0, %v697_v1 }
  0x20   : > { %s675_s2 = scalar_lea.vmem %s2041_s4, %s2101_s30  ;;  %s1880_s25 = scalar_lea.vmem %s2053_s16, %s1487_s24 }
  0x21   : > { %s687_s19 = scalar_lea.vmem %s2054_s17, %s1856_s23  ;;  %s691_s14 = scalar_lea.vmem %s2055_s18, %s1856_s23 }
  0x22 PF: > { %v1643_v2 = vld [vmem:[%s2043_s6] sm:$0xff]   ;;  %v1711_v3 = vmov 0.0   ;;  %v1645_v5 = vld [vmem:[%s2043_s6 + $0x8] sm:$0xff]   ;;  %vm1712_vm1 = vmmov 0   ;;  %vm726_vm2 = vcmask 261120   ;;  %s2080_s22 = sld [smem:[#allocation14_spill]] }
  0x23   : > { %1545 = vmatprep.subr.bf16.mxu0 %v1711_v3  ;;  %1553 = vmatprep.subr.bf16.mxu1 %v1711_v3  ;;  %v1644_v4 = vld [vmem:[%s2044_s7] sm:$0xff]   ;;  %v1646_v6 = vld [vmem:[%s2044_s7 + $0x8] sm:$0xff]   ;;  %s1713_s26 = smov 64   ;;  %s2081_s13 = sld [smem:[#allocation13_spill]]  ;;  %vm925_vm3 = vcmask 59392   ;;  %vm942_vm4 = vcmask 1043456  }
  0x24   : > { %1546 = vmatpush3.bf16.msra.mxu0 %v1643_v2  ;;  %1549 = vmatprep.mubr.msk.bf16.mxu0 %vm1712_vm1, %v1711_v3  ;;  %v1913_v7 = vld [vmem:[%s661_s0] sm:$0x7]  ;;  %s1714_s10 = smov 96   ;;  %s1715_s11 = smov 32   ;;  %vm938_vm5 = vcmask 64512   ;;  %v1716_v1 = vmov (!%p1494_p7), 0.0  }
  0x25   : > { %1554 = vmatpush3.bf16.msra.mxu1 %v1644_v4  ;;  %1547 = vmatprep.subr.bf16.mxu0 %v1711_v3  ;;  %v702_v9 = vpack.c.bf16 %v1913_v7, %v1913_v7  ;;  %v867_v32 = vld [vmem:[%s669_s21] sm:$0xf]  ;;  %s2083_s27 = sld [smem:[#allocation15_spill]] (!%p1494_p7)  ;;  %vm1717_vm6 = vmmov (!%p1494_p7), 0   ;;  %s2084_s15 = sld [smem:[#allocation16_spill]] (!%p1494_p7) }
  0x26   : > { %1555 = vmatprep.subr.bf16.mxu1 %v1711_v3  ;;  %1557 = vmatprep.mubr.msk.bf16.mxu1 %vm1712_vm1, %v1711_v3  ;;  %v701_v8 = vld [vmem:[#allocation2] sm:$0x7]  ;;  %v883_v33 = vsel %vm726_vm2, %v867_v32, 0  ;;  %v943_v55 = vsel %vm942_vm4, %v867_v32, 0 }
  0x27   : > { %v770_v10 = vpack.c.bf16 %v701_v8, %v701_v8  ;;  %v1504_v43 = vld [vmem:[%s672_s12] ss:$0 sm:$0xff] }
  0x28   : > { %1548 = vmatpush3.bf16.msra.mxu0 %v1645_v5  ;;  %v1499_v11 = vld [vmem:[%s2080_s22] ss:$0 sm:$0xff] }
  0x29   : > { %1556 = vmatpush3.bf16.msra.mxu1 %v1646_v6  ;;  %1561 = vmatprep.subr.bf16.mxu0 %v1711_v3  ;;  %v1495_v21 = vld [vmem:[%s2081_s13] ss:$0 sm:$0xff] }
  0x2a   : > { %1567 = vmatprep.subr.bf16.mxu1 %v1711_v3 }
  0x2b   : > { %1550 = vmatmul.mubr.msk.bf16.vlgmr.msra.gmra.mrb[0].mxu0 %vm726_vm2, %v702_v9  ;;  %v1657_v0 = vld [vmem:[%s2083_s27] sm:$0xff] (!%p1494_p7)   ;;  %v1658_v2 = vld [vmem:[%s2083_s27 + $0x8] sm:$0xff] (!%p1494_p7)  }
  0x2c   : > { %1558 = vmatmul.mubr.msk.bf16.vlgmr.msra.gmra.mrb[0].mxu1 %vm726_vm2, %v770_v10  ;;  %1563 = vmatprep.mubr.msk.bf16.mxu0 %vm1712_vm1, %v1711_v3  ;;  %v1508_v5 = vld [vmem:[%s2084_s15] ss:$0 sm:$0xff] (!%p1494_p7) }
  0x2d   : > { %1569 = vmatprep.mubr.msk.bf16.mxu1 %vm1712_vm1, %v1711_v3  ;;  %1568 = vmatpush3.bf16.msra.mxu1 %v943_v55 }
  0x31   : > { %1562 = vmatpush3.bf16.xpose.msra.mxu0 %v883_v33 }
  0x32   : > { %1573 = vmatprep.subr.bf16.mxu0 (!%p1494_p7), %v1716_v1 }
  0xfe   : > { %v764_v12 = vpop.f32.mrb[0].mxu0 }
  0xff   : > { %v831_v13 = vpop.f32.mrb[0].mxu1  ;;  %v1551_v14 = vpop.f32.mrb[1].mxu0  ;;  %v765_v22 = vadd.f32 %v1495_v21, %v764_v12 }
 0x100   : > { %v832_v15 = vadd.f32 %v1499_v11, %v831_v13  ;;  %v1559_v16 = vpop.f32.mrb[1].mxu1  ;;  %v767_v17 = vpop.f32.mrb[2].mxu0 }
 0x101   : > { %v834_v18 = vpop.f32.mrb[2].mxu1  ;;  %v1552_v19 = vpop.f32.mrb[3].mxu0 }
 0x102   : > { %845 = vrot.lane.b32.xlu0 %v832_v15, %s1713_s26  ;;  %v1560_v20 = vpop.f32.mrb[3].mxu1  ;;  %v837_v23 = vadd.f32 %v832_v15, %v765_v22 }
 0x104   : > { %v1503_v24 = vmul.f32 -1.442695, %v837_v23 }
 0x106   : > { %1647 = vpow2.f32 %v1503_v24 }
 0x110   : > { %v1648_v25 = vpop.eup %1647 }
 0x111   : > { %v841_v26 = vadd.f32 1.0, %v1648_v25 }
 0x113   : > { %1649 = vrcp.f32 %v841_v26 }
 0x11d   : > { %v1650_v27 = vpop.eup %1649 }
 0x11e   : > { %v855_v36 = vsub.f32 1.0, %v1650_v27 }
 0x174   : > { %v846_v28 = vpop.permute.xlu0 %845 }
 0x175   : > { %v848_v29 = vmul.f32 %v1650_v27, %v846_v28 }
 0x177   : > { %850 = vrot.lane.b32.xlu0 %v848_v29, %s1713_s26 }
 0x1e9   : > { %v851_v30 = vpop.permute.xlu0 %850 }
 0x1ea   : > { %v853_v31 = vadd.f32 %v851_v30, %v765_v22 }
 0x1ec   : > { %1651 = vtanh.f32 %v853_v31 }
 0x1f6   : > { %v1652_v34 = vpop.eup %1651 }
 0x1f7   : > { %857 = vrot.lane.b32.xlu1 %v1652_v34, %s1714_s10 }
 0x1fb   : > { %862 = vrot.lane.b32.xlu1 %v701_v8, %s1715_s11 }
 0x269   : > { %v858_v35 = vpop.permute.xlu1 %857 }
 0x26a   : > { %v860_v38 = vmul.f32 %v858_v35, %v855_v36 }
 0x26d   : > { %v863_v37 = vpop.permute.xlu1 %862 }
 0x26e   : > { %v865_v39 = vmul.f32 %v1650_v27, %v863_v37 }
 0x270   : > { %v1939_v40 = vadd.f32 %v865_v39, %v860_v38 }
 0x272   : > { %v868_v41 = vpack.c.bf16 %v1939_v40, %v1939_v40 }
 0x274   : > { %877 = vrot.lane.b32.xlu0 %v868_v41, %s1714_s10 }
 0x2e6   : > { %v1944_v42 = vpop.permute.xlu0 %877 }
 0x2e7   : > { %1564 = vmatmul.mubr.msk.bf16.vlgmr.msra.gmra.mrb[4].mxu0 %vm726_vm2, %v1944_v42 }
 0x2e8   : > { %1574 = vmatpush3.bf16.msra.mxu0 (!%p1494_p7), %v1657_v0  ;;  %1577 = vmatprep.mubr.msk.bf16.mxu0 (!%p1494_p7), %vm1717_vm6, %v1716_v1 }
 0x2e9   : > { %1575 = vmatprep.subr.bf16.mxu0 (!%p1494_p7), %v1716_v1 }
 0x2ec   : > { %1576 = vmatpush3.bf16.msra.mxu0 (!%p1494_p7), %v1658_v2 }
 0x3ba   : > { %v919_v44 = vpop.f32.mrb[4].mxu0 }
 0x3bb   : > { %v920_v45 = vadd.f32 %v1504_v43, %v919_v44  ;;  %v1565_v46 = vpop.f32.mrb[5].mxu0 }
 0x3bc   : > { %v922_v47 = vpop.f32.mrb[6].mxu0 }
 0x3bd   : > { %v1566_v48 = vpop.f32.mrb[7].mxu0  ;;  %v926_v49 = vsel %vm925_vm3, %v920_v45, -inf }
 0x3be   : > { %927 = vmax.xlane.f32.xlu1 %v926_v49 }
 0x44b   : > { %v928_v50 = vpop.xlane.xlu1 %927 }
 0x44c   : > { %v929_v51 = vsub.f32 %v920_v45, %v928_v50 }
 0x44e   : > { %v930_v52 = vmul.f32 1.442695, %v929_v51 }
 0x450   : > { %1653 = vpow2.f32 %v930_v52 }
 0x45a   : > { %v1654_v53 = vpop.eup %1653 }
 0x45b   : > { %v932_v54 = vsel %vm925_vm3, %v1654_v53, 0.0 }
 0x45c   : > { %933 = vadd.xlane.f32.xlu0 %v932_v54 }
 0x4e9   : > { %v934_v56 = vpop.xlane.xlu0 %933 }
 0x4ea   : > { %1655 = vrcp.f32 %v934_v56 }
 0x4f4   : > { %v1656_v57 = vpop.eup %1655 }
 0x4f5   : > { %v936_v58 = vmul.f32 %v1656_v57, %v1654_v53 }
 0x4f7   : > { %v937_v59 = vpack.c.bf16 %v936_v58, %v936_v58 }
 0x4f9   : > { %1570 = vmatmul.mubr.msk.bf16.vlgmr.msra.gmra.mrb[4].mxu1 %vm938_vm5, %v937_v59 }
 0x5c9   : > { %987 = sbr.rel (%p1494_p7) target bundleno = 1702 (0x6a6), region = 92 }
 0x5cc   : > { %v979_v60 = vpop.f32.mrb[4].mxu1 }
 0x5cd   : > { %v1571_v61 = vpop.f32.mrb[5].mxu1  ;;  %v988_v4 = vpack.c.bf16 (!%p1494_p7), %v979_v60, %v979_v60 }
 0x5ce   : > { %v982_v62 = vpop.f32.mrb[6].mxu1 }
 0x5cf   : > { %v1572_v63 = vpop.f32.mrb[7].mxu1  ;;  %1578 = vmatmul.mubr.msk.bf16.vlgmr.msra.gmra.mrb[0].mxu0 (!%p1494_p7), %vm726_vm2, %v988_v4 }
 0x6a2   : > { %v1049_v6 = vpop.f32.mrb[0].mxu0 }
 0x6a3   : > { %v1050_v8 = vadd.f32 %v1508_v5, %v1049_v6  ;;  %v1579_v9 = vpop.f32.mrb[1].mxu0 }
 0x6a4   : > { %v1052_v10 = vpop.f32.mrb[2].mxu0 }
 0x6a5   : > { %1055 = vst [vmem:[%s687_s19] sm:$0x7] %v1050_v8  ;;  %v1580_v11 = vpop.f32.mrb[3].mxu0 }
 0x6a6 PF: > { %s2085_s9 = sld [smem:[#allocation17_spill]]  ;;  %1581 = vmatprep.subr.bf16.mxu0 %v1711_v3  ;;  %1585 = vmatprep.mubr.msk.bf16.mxu0 %vm1712_vm1, %v1711_v3  ;;  %s2086_s12 = sld [smem:[#allocation12_spill]]  ;;  %v1520_v14 = vld [vmem:[%s675_s2] ss:$0 sm:$0xff]  ;;  %v1188_v16 = vlaneseq  ;;  %v1718_v21 = vmov 1.0   ;;  %vm1112_vm8 = vcmask 518144  }
 0x6a7   : > { %1589 = vmatprep.subr.mxu1 %v1711_v3  ;;  %1591 = vmatprep.mubr.msk.f32.mxu1 %vm1712_vm1, %v1711_v3  ;;  %vm1138_vm9 = vcmask 256000   ;;  %s2088_s15 = sld [smem:[#allocation18_spill]]  ;;  %v1719_v33 = vmov 0   ;;  %v1518_v44 = vld [vmem:[#allocation3] ss:$0 sm:$0xff]  ;;  %p1524_p8 = scmp.ne.s32.totalorder %s1693_s29, 3 }
 0x6a8   : > { %v1189_v19 = vand.u32 127, %v1188_v16  ;;  %1660 = vset.pattern.permute.xlu0 %v1719_v33  ;;  %1659 = vset.pattern.permute.xlu1 %v1719_v33 }
 0x6ac   : > { %v1515_v12 = vld [vmem:[%s2085_s9] ss:$0 sm:$0xff]  ;;  %v1662_v15 = vld [vmem:[%s2086_s12 + $0x8] sm:$0xff]  }
 0x6ad   : > { %1130 = vrot.lane.b32.xlu0 %v1515_v12, %s1715_s11  ;;  %v1661_v13 = vld [vmem:[%s2086_s12] sm:$0xff]   ;;  %s2087_s11 = sld [smem:[#allocation19_spill]] }
 0x6ae   : > { %1582 = vmatpush3.bf16.msra.mxu0 %v1661_v13  ;;  %v1516_v29 = vld [vmem:[%s2088_s15] ss:$0 sm:$0xff] }
 0x6af   : > { %1583 = vmatprep.subr.bf16.mxu0 %v1711_v3  ;;  %v1149_v30 = vmul.f32 %v1516_v29, %v979_v60 }
 0x6b1   : > { %1186 = vbcast.lane.b32.xlu0 %v1520_v14, 256 }
 0x6b2   : > { %1584 = vmatpush3.bf16.msra.mxu0 %v1662_v15 }
 0x6b3   : > { %v1517_v3 = vld [vmem:[%s2087_s11] ss:$0 sm:$0xff] }
 0x6b4   : > { %v1161_v22 = vmul.f32 %v1517_v3, %v1913_v7  ;;  %v1150_v7 = vsel %vm1138_vm9, %v1149_v30, 0.0 }
 0x6b5   : > { %1586 = vmatmul.mubr.msk.bf16.vlgmr.msra.gmra.mrb[0].mxu0 %vm726_vm2, %v1944_v42 }
 0x6b6   : > { %v1162_v28 = vsel %vm1138_vm9, %v1161_v22, 0.0 }
 0x71f   : > { %v1131_v17 = vpop.permute.xlu0 %1130 }
 0x720   : > { %v1133_v18 = vmul.f32 %v1131_v17, %v1939_v40 }
 0x722   : > { %1135 = vrot.lane.b32.xlu1 %v1133_v18, %s1714_s10 }
 0x723   : > { %v1187_v20 = vpop.permute.xlu0 %1186 }
 0x724   : > { %vm1190_vm7 = vcmp.eq.s32.totalorder %v1187_v20, %v1189_v19 }
 0x725   : > { %1590 = vmatpush3.msk.msra.mxu1 %vm1190_vm7, %v1718_v21 }
 0x726   : > { %1592 = vmatmul.mubr.msk.f32.vlgmr.msra.gmra.mrb[0].mxu1 %vm938_vm5, %v936_v58 }
 0x788   : > { %v1106_v23 = vpop.f32.mrb[0].mxu0 }
 0x789   : > { %v1113_v24 = vsel %vm1112_vm8, %v1106_v23, -inf  ;;  %v1587_v25 = vpop.f32.mrb[1].mxu0 }
 0x78a   : > { %1114 = vmax.xlane.f32.xlu1 %v1113_v24  ;;  %v1109_v26 = vpop.f32.mrb[2].mxu0 }
 0x78b   : > { %v1588_v27 = vpop.f32.mrb[3].mxu0 }
 0x78e   : > { %1163 = vadd.xlane.f32.xlu1 %v1162_v28 }
 0x794   : > { %v1136_v31 = vpop.permute.xlu1 %1135 }
 0x795   : > { %v1139_v32 = vsel %vm1138_vm9, %v1136_v31, 0.0 }
 0x796   : > { %1140 = vadd.xlane.f32.xlu0 %v1139_v32 }
 0x79a   : > { %1151 = vadd.xlane.f32.xlu0 %v1150_v7 }
 0x7f9   : > { %v1262_v52 = vpop.f32.mrb[0].mxu1 }
 0x7fa   : > { %v1593_v53 = vpop.f32.mrb[1].mxu1 }
 0x817   : > { %v1115_v34 = vpop.xlane.xlu1 %1114 }
 0x818   : > { %v1116_v35 = vsub.f32 %v1106_v23, %v1115_v34 }
 0x81a   : > { %v1117_v36 = vmul.f32 1.442695, %v1116_v35 }
 0x81b   : > { %v1164_v41 = vpop.xlane.xlu1 %1163 }
 0x81c   : > { %1663 = vpow2.f32 %v1117_v36 }
 0x823   : > { %v1141_v37 = vpop.xlane.xlu0 %1140 }
 0x826   : > { %v1664_v38 = vpop.eup %1663 }
 0x827   : > { %v1152_v39 = vpop.xlane.xlu0 %1151  ;;  %v1119_v43 = vsel %vm1112_vm8, %v1664_v38, 0.0 }
 0x828   : > { %v1153_v42 = vadd.f32 %v1152_v39, %v1141_v37  ;;  %1120 = vadd.xlane.f32.xlu0 %v1119_v43 }
 0x82a   : > { %v1165_v45 = vadd.f32 %v1164_v41, %v1153_v42 }
 0x82c   : > { %v1173_v46 = vadd.f32 %v1518_v44, %v1165_v45 }
 0x82e   : > { %v1519_v47 = vmul.f32 -1.442695, %v1173_v46 }
 0x830   : > { %1665 = vpow2.f32 %v1519_v47 }
 0x83a   : > { %v1666_v48 = vpop.eup %1665 }
 0x83b   : > { %v1177_v49 = vadd.f32 1.0, %v1666_v48 }
 0x83d   : > { %1667 = vrcp.f32 %v1177_v49 }
 0x847   : > { %v1668_v50 = vpop.eup %1667 }
 0x848   : > { %1275 = vperm.xlu0 %1660, %v1668_v50   ;;  %v1266_v51 = vsub.f32 1.0, %v1668_v50 }
 0x84a   : > { %1269 = vperm.xlu1 %1659, %v1266_v51  }
 0x84e   : > { %1282 = vrot.lane.b32.xlu1 %v1939_v40, %s1714_s10 }
 0x8b5   : > { %v1121_v54 = vpop.xlane.xlu0 %1120 }
 0x8b6   : > { %1669 = vrcp.f32 %v1121_v54 }
 0x8c0   : > { %v1670_v55 = vpop.eup %1669 }
 0x8c1   : > { %v1123_v57 = vmul.f32 %v1670_v55, %v1664_v38 }
 0x8c7   : > { %v1276_v56 = vpop.permute.xlu0 %1275 }
 0x8c8   : > { %v1278_v59 = vmul.f32 %v1276_v56, %v1123_v57 }
 0x8c9   : > { %v1270_v58 = vpop.permute.xlu1 %1269  ;;  %1289 = sbr.rel (%p1524_p8) target bundleno = 2256 (0x8d0), region = 96 }
 0x8ca   : > { %v1272_v60 = vmul.f32 %v1270_v58, %v1262_v52 }
 0x8cc   : > { %v1279_v61 = vadd.f32 %v1278_v59, %v1272_v60 }
 0x8cd   : > { %v1283_v62 = vpop.permute.xlu1 %1282 }
 0x8ce   : > { %1280 = vst.msk [vmem:[%s1880_s25] sm:$0x7] %vm1112_vm8, %v1279_v61 }
 0x8cf   : > { %1285 = vst.msk [vmem:[#allocation2] sm:$0x7] %vm1138_vm9, %v1283_v62  ;;  %1290 = vst.msk [vmem:[%s691_s14] sm:$0x7] (!%p1524_p8), %vm1138_vm9, %v1283_v62 }
 0x8d0 PF: > { %s2089_s13 = sld [smem:[#allocation6_spill]]  ;;  %s2090_s29 = sld [smem:[#allocation4_spill]] }
 0x8d1   : > { %s2091_s30 = sld [smem:[#allocation5_spill]]  ;;  %s2092_s0 = sld [smem:[#allocation7_spill]] }
 0x8d2   : > { %s2093_s19 = sld [smem:[#allocation8_spill]] }
 0x8d6   : > { %s31_s1 = sadd.s32 1, %s2089_s13  }
 0x8d7   : > { %p28_p9 = scmp.ge.s32.totalorder %s31_s1, 10  }
 0x8d9   :  { %30 = sbr.rel (!%p28_p9) target bundleno = 12 (0xc), region = 162 }

</bundles_post_ra>
